<compile_context>
chip_gen: v5e
topology: v5e:2x2
jax: 0.10.0
libtpu: 0.0.40
codegen_flags: <defaults>
</compile_context>

<pallas_src>
import math

import jax
import jax.numpy as jnp
from jax.experimental import pallas as pl
from jax.experimental.pallas import tpu as pltpu


def _dytanh_kernel(scal_ref, betas_ref, x_ref, o_ref):
    # scal_ref : (2,) SMEM  -> [alpha, gamma]
    # betas_ref: (2, W) VMEM-resident -> [beta1 ; beta] tiled to lane width W
    # x_ref / o_ref: (TM, W) tiles
    alpha = scal_ref[0]
    gamma = scal_ref[1]
    x = x_ref[...].astype(jnp.float32)
    # NOTE(v7x): jnp.tanh lowers to the EUP; if the EUP slot ever binds above
    # the 3.2 TB/s roofline, rewrite as 1 - 2*pl.reciprocal(exp(2x)+1, approx=True).
    y = gamma * jnp.tanh(alpha * x + betas_ref[0:1, :]) + betas_ref[1:2, :]
    o_ref[...] = y.astype(o_ref.dtype)


def _vmem_capacity_bytes():
    try:
        return int(pltpu.get_tpu_info().vmem_capacity_bytes)
    except Exception:
        return 64 * 1024 * 1024  # conservative fallback (v7x per-core VMEM)


def dytanh(x, alpha, gamma, beta1, beta):
    """y = gamma * tanh(alpha * x + beta1) + beta, channels-last broadcast."""
    orig_shape = x.shape
    C = orig_shape[-1]

    # ---- lane-dense regrouping: rows of width W = lcm(C, 128) ---------------
    W = (C * 128) // math.gcd(C, 128)
    x_flat = x.reshape(-1)                  # contiguous reshape: bitcast, no copy
    L = x_flat.shape[0]
    R = L // W                              # full lane-dense rows
    rem = L - R * W                         # < W leftover elements (rare)

    # ---- parameters ----------------------------------------------------------
    alpha_s = jnp.asarray(alpha, jnp.float32).reshape(())
    gamma_s = jnp.asarray(gamma, jnp.float32).reshape(())
    beta1_c = jnp.asarray(beta1, jnp.float32).reshape(C)
    beta_c = jnp.asarray(beta, jnp.float32).reshape(C)

    parts = []
    if R > 0:
        scal = jnp.stack([alpha_s, gamma_s])                       # (2,) -> SMEM
        betas = jnp.stack([jnp.tile(beta1_c, W // C),
                           jnp.tile(beta_c, W // C)])              # (2, W) -> VMEM

        # ---- row-tile size: by bytes, dtype-aware sublane rounding ----------
        itemsize = jnp.dtype(x.dtype).itemsize
        sub = max(8, 32 // itemsize)        # 8 f32 / 16 bf16 / 32 int8,fp8
        row_bytes = W * itemsize
        vmem_cap = _vmem_capacity_bytes()
        tile_budget = min(6 << 20, vmem_cap // 12)   # ~5-6 MiB, v7x-safe
        TM = max(sub, (tile_budget // row_bytes) // sub * sub)
        TM = min(TM, pl.cdiv(R, sub) * sub)          # never larger than needed
        tile_bytes = TM * row_bytes

        # in+out double-buffered => ~4 tiles resident (+ params + slack)
        vmem_limit = 4 * tile_bytes + (4 << 20)
        vmem_limit = max(vmem_limit, 32 << 20)
        vmem_limit = min(vmem_limit, int(vmem_cap * 0.9))

        if rem:
            x_main = jax.lax.slice(x_flat, (0,), (R * W,)).reshape(R, W)
        else:
            x_main = x_flat.reshape(R, W)   # bitcast, no copy

        out_main = pl.pallas_call(
            _dytanh_kernel,
            out_shape=jax.ShapeDtypeStruct((R, W), x.dtype),
            grid_spec=pltpu.PrefetchScalarGridSpec(
                num_scalar_prefetch=1,
                grid=(pl.cdiv(R, TM),),      # partial last tile handled by masking
                in_specs=[
                    pl.BlockSpec((2, W), lambda i, s: (0, 0)),    # betas (resident)
                    pl.BlockSpec((TM, W), lambda i, s: (i, 0)),   # x tile
                ],
                out_specs=pl.BlockSpec((TM, W), lambda i, s: (i, 0)),
            ),
            compiler_params=pltpu.CompilerParams(
                dimension_semantics=("parallel",),
                vmem_limit_bytes=vmem_limit,
            ),
        )(scal, betas, x_main)
        parts.append(out_main.reshape(-1))

    if rem:
        # Tiny tail (< W elements): plain jnp, avoids padding a whole HBM pass.
        ch = jnp.arange(rem) % C
        xt = x_flat[R * W:].astype(jnp.float32)
        yt = gamma_s * jnp.tanh(alpha_s * xt + beta1_c[ch]) + beta_c[ch]
        parts.append(yt.astype(x.dtype))

    out_flat = parts[0] if len(parts) == 1 else jnp.concatenate(parts)
    return out_flat.reshape(orig_shape)


if __name__ == "__main__":
    key = jax.random.PRNGKey(0)
    kx, ka, kg, kb, kb1 = jax.random.split(key, 5)

    B, L, C = 2, 8, 64
    x = jax.random.normal(kx, (B, L, C), jnp.float32)
    # Parameters shaped exactly like the PyTorch module (values made nontrivial).
    alpha = 1.0 + 0.5 * jax.random.normal(ka, (1, 1, 1), jnp.float32)
    gamma = 1.0 + 0.5 * jax.random.normal(kg, (1, 1, 1), jnp.float32)
    beta = 0.1 * jax.random.normal(kb, (1, 1, C), jnp.float32)
    beta1 = 0.1 * jax.random.normal(kb1, (1, 1, C), jnp.float32)

    out = jax.block_until_ready(dytanh(x, alpha, gamma, beta1, beta))
    ref = gamma * jnp.tanh(alpha * x + beta1) + beta
    assert out.shape == x.shape
    assert jnp.allclose(out, ref, atol=1e-5, rtol=1e-5), "mismatch (even case)"

    # Odd leading extent: exercises the masked partial row-tile + jnp tail path.
    x2 = jax.random.normal(kx, (3, 5, C), jnp.float32)
    out2 = jax.block_until_ready(dytanh(x2, alpha, gamma, beta1, beta))
    ref2 = gamma * jnp.tanh(alpha * x2 + beta1) + beta
    assert out2.shape == x2.shape
    assert jnp.allclose(out2, ref2, atol=1e-5, rtol=1e-5), "mismatch (odd case)"

    print("KERNEL_OK")
</pallas_src>

<mosaic_0001>
module attributes {stable_mosaic.version = 11 : i64} {
  func.func @_dytanh_kernel(%arg0: i32, %arg1: memref<2xf32, #tpu.memory_space<smem>>, %arg2: memref<2x128xf32, #tpu.memory_space<vmem>>, %arg3: memref<8x128xf32, #tpu.memory_space<vmem>>, %arg4: memref<8x128xf32, #tpu.memory_space<vmem>>) attributes {dimension_semantics = [#tpu.dimension_semantics<parallel>], iteration_bounds = array<i64: 1>, scalar_prefetch = 1 : i64, scratch_operands = 0 : i64, tpu.core_type = #tpu.core_type<tc>, window_params = [{pipeline_mode = #tpu.pipeline_mode<synchronous>, transform_indices = @transform_0, window_bounds = array<i64: 2, 128>}, {transform_indices = @transform_1, window_bounds = array<i64: 8, 128>}, {transform_indices = @transform_2, window_bounds = array<i64: 8, 128>}]} {
    %c0 = arith.constant 0 : index
    %0 = memref.load %arg1[%c0] : memref<2xf32, #tpu.memory_space<smem>>
    %c1 = arith.constant 1 : index
    %1 = memref.load %arg1[%c1] : memref<2xf32, #tpu.memory_space<smem>>
    %c0_0 = arith.constant 0 : index
    %c0_1 = arith.constant 0 : index
    %2 = vector.load %arg3[%c0_0, %c0_1] : memref<8x128xf32, #tpu.memory_space<vmem>>, vector<8x128xf32>
    %3 = vector.broadcast %0 : f32 to vector<8x128xf32>
    %4 = arith.mulf %3, %2 : vector<8x128xf32>
    %c0_2 = arith.constant 0 : index
    %c0_3 = arith.constant 0 : index
    %5 = vector.load %arg2[%c0_2, %c0_3] : memref<2x128xf32, #tpu.memory_space<vmem>>, vector<1x128xf32>
    %6 = vector.broadcast %5 : vector<1x128xf32> to vector<8x128xf32>
    %7 = arith.addf %4, %6 : vector<8x128xf32>
    %8 = math.tanh %7 : vector<8x128xf32>
    %9 = vector.broadcast %1 : f32 to vector<8x128xf32>
    %10 = arith.mulf %9, %8 : vector<8x128xf32>
    %c1_4 = arith.constant 1 : index
    %c0_5 = arith.constant 0 : index
    %11 = vector.load %arg2[%c1_4, %c0_5] : memref<2x128xf32, #tpu.memory_space<vmem>>, vector<1x128xf32>
    %12 = vector.broadcast %11 : vector<1x128xf32> to vector<8x128xf32>
    %13 = arith.addf %10, %12 : vector<8x128xf32>
    %c0_6 = arith.constant 0 : index
    %c0_7 = arith.constant 0 : index
    %14 = vector.load %arg4[%c0_6, %c0_7] : memref<8x128xf32, #tpu.memory_space<vmem>>, vector<8x128xf32>
    tpu.vector_store %arg4[%c0_6, %c0_7], %13 {strides = array<i32>} : memref<8x128xf32, #tpu.memory_space<vmem>>, vector<8x128xf32>,
    return
  }
  func.func @transform_0(%arg0: i32, %arg1: memref<2xf32, #tpu.memory_space<smem>>) -> (i32, i32) {
    %c0_i32 = arith.constant 0 : i32
    %c0_i32_0 = arith.constant 0 : i32
    %c0_i32_1 = arith.constant 0 : i32
    return %c0_i32, %c0_i32_0 : i32, i32
  }
  func.func @transform_1(%arg0: i32, %arg1: memref<2xf32, #tpu.memory_space<smem>>) -> (i32, i32) {
    %c0_i32 = arith.constant 0 : i32
    %c0_i32_0 = arith.constant 0 : i32
    return %arg0, %c0_i32 : i32, i32
  }
  func.func @transform_2(%arg0: i32, %arg1: memref<2xf32, #tpu.memory_space<smem>>) -> (i32, i32) {
    %c0_i32 = arith.constant 0 : i32
    %c0_i32_0 = arith.constant 0 : i32
    return %arg0, %c0_i32 : i32, i32
  }
}

</mosaic_0001>

<bundles_post_ra>
// kernel: tpu_custom_call.1
= control target key start
LH: loop header
LB: loop body
LE: loop exit
PB: predicated region body
PF: predicated region fallthrough
CT: control target
= control target key end

     0   :  { %s183_s15 = smov [#allocation3]   ;;  %s219_s0 = inlined_call_operand.hbm [shape: f32[2], index: 0, kind: input, shape index: {}]   ;;  %s220_s1 = inlined_call_operand.hbm [shape: f32[2,128], index: 1, kind: input, shape index: {}]   ;;  %s221_s2 = inlined_call_operand.hbm [shape: f32[8,128], index: 2, kind: input, shape index: {}]   ;;  %s222_s3 = inlined_call_operand.hbm [shape: f32[8,128], index: 3, kind: output, shape index: {}]  }
   0x1   :  { %s9_s14 = sshll.u32 %s219_s0, 4  ;;  %s10_s14 = int_to_ptr.hbm [resolvable:$true] %s9_s14 }
   0x2   :  { %12 = dma.hbm_to_smem %s10_s14, 16, %s183_s15, [#allocation2] }
   0x3   :  { %175 = dma.done.wait [#allocation2], 16 }
   0x4   :  { %176 = vsyncadd [#allocation2], 4294967280 }
   0x5   :  { %15 = sfence }
   0x6   :  { %16 = vsyncpa [#allocation5], 0 }
   0x7   :  { %17 = vsyncpa [#allocation8], 0 }
   0x8   :  { %18 = vsyncpa [#allocation6], 0  ;;  %s24_s18 = sshll.u32 %s220_s1, 4  ;;  %s184_s19 = smov [#allocation4]   ;;  %s25_s18 = int_to_ptr.hbm [resolvable:$true] %s24_s18 }
   0x9   :  { %s26_s20 = sshll.u32 %s184_s19, 4  ;;  %s35_s0 = sshll.u32 %s221_s2, 4  ;;  %s27_s20 = int_to_ptr.vmem [resolvable:$true] %s26_s20  ;;  %s36_s0 = int_to_ptr.hbm [resolvable:$true] %s35_s0 }
   0xa   :  { %29 = dma.hbm_to_vmem [thread:$0]  %s25_s18, 32, %s27_s20, [#allocation5]  }
   0xb   :  { %s185_s23 = smov [#allocation7]  }
   0xc   :  { %s37_s24 = sshll.u32 %s185_s23, 4  ;;  %s38_s24 = int_to_ptr.vmem [resolvable:$true] %s37_s24 }
   0xd   :  { %40 = dma.hbm_to_vmem [thread:$0]  %s36_s0, 128, %s38_s24, [#allocation8]  }
   0xe   :  { %177 = dma.done.wait [#allocation5], 32  }
   0xf   :  { %178 = vsyncadd [#allocation5], 4294967264 }
  0x10   :  { %179 = dma.done.wait [#allocation8], 128  }
  0x11   :  { %180 = vsyncadd [#allocation8], 4294967168  ;;  %s49_s25 = sld [smem:[#allocation3]]  ;;  %v51_v1 = vld [vmem:[#allocation7] sm:$0xff]  ;;  %v87_v2 = vld [vmem:[#allocation4] ss:$0 sm:$0xff] }
  0x12   :  { %s82_s1 = sld [smem:[#allocation3 + $0x1]]  ;;  %v88_v6 = vld [vmem:[#allocation4 + $0x1] ss:$0 sm:$0xff]  ;;  %s186_s2 = smov [#allocation9]  }
  0x13   :  { %s69_s26 = sshll.u32 %s186_s2, 4  ;;  %s71_s29 = sshll.u32 %s222_s3, 4  ;;  %s70_s26 = int_to_ptr.vmem [resolvable:$true] %s69_s26  ;;  %s72_s29 = int_to_ptr.hbm [resolvable:$true] %s71_s29 }
  0x17   :  { %v52_v0 = vstv %s49_s25 }
  0x18   :  { %v53_v3 = vmul.f32 %v52_v0, %v51_v1  ;;  %v58_v5 = vstv %s82_s1 }
  0x1a   :  { %v56_v4 = vadd.f32 %v87_v2, %v53_v3 }
  0x1c   :  { %89 = vtanh.f32 %v56_v4 }
  0x22   :  { %v90_v7 = vpop.eup %89 }
  0x23   :  { %v59_v8 = vmul.f32 %v90_v7, %v58_v5 }
  0x25   :  { %v62_v9 = vadd.f32 %v88_v6, %v59_v8 }
  0x27   :  { %63 = vst [vmem:[#allocation9] sm:$0xff] %v62_v9 }
  0x28   :  { %74 = dma.vmem_to_hbm [thread:$0]  %s70_s26, 128, %s72_s29, [#allocation6]  }
  0x29   :  { %181 = dma.done.wait [#allocation6], 128  }
  0x2a   :  { %182 = vsyncadd [#allocation6], 4294967168 }
  0x2b   :  { %79 = vsyncpa [#allocation5], 1 }
  0x2c   :  { %80 = vsyncpa [#allocation8], 1 }
  0x2d   :  { %81 = vsyncpa [#allocation6], 1 }

</bundles_post_ra>
